<compile_context>
chip_gen: v5e
topology: v5e:2x2
jax: 0.10.0
libtpu: 0.0.40
codegen_flags: <defaults>
</compile_context>

<pallas_src>
import functools
import math

import jax
import jax.numpy as jnp
from jax.experimental import pallas as pl
from jax.experimental.pallas import tpu as pltpu


def _round_up(x, m):
    return ((x + m - 1) // m) * m


def _adacos_kernel(s_ref, x_ref, wt_ref, invx_ref, invw_ref,
                   logits_ref, bsum_ref, *scratch, nk):
    """One (i, j, k) grid step.

    s_ref      : (1,)      f32  SMEM -- previous AdaCos scale (runtime value)
    x_ref      : (tb, tk)  VMEM      -- raw (un-normalized) feature tile
    wt_ref     : (tk, tc)  VMEM      -- raw W^T tile (lane-dense along classes)
    invx_ref   : (tb, 1)   f32  VMEM -- 1 / max(||x_row||, eps)
    invw_ref   : (1, tc)   f32  VMEM -- 1 / max(||W_class||, eps)
    logits_ref : (tb, tc)  f32       -- cosine logits tile (output)
    bsum_ref   : (8, tc)   f32       -- sublane partials of sum(exp(s*logits))
    scratch    : (acc_ref,) only when nk > 1 -- f32 raw-dot accumulator
    """
    # Scalar read at top level (never inside a pl.when body).
    s0 = s_ref[0]

    # Raw partial dot on the MXU (bf16 operands, f32 accumulation).
    prod = jnp.dot(x_ref[...], wt_ref[...], preferred_element_type=jnp.float32)

    def finalize(acc):
        tb, tc = logits_ref.shape
        # Post-matmul rank-1 normalization: cos = (x . w) / (||x|| ||w||).
        logits = acc * invx_ref[...] * invw_ref[...]
        logits_ref[...] = logits
        e = jnp.exp(s0 * logits)
        # Leading-axis reduction only (tile-aligned reshape, pure VPU adds);
        # the wrapper finishes the sum.  Lane-dense (8, tc) store.
        bsum_ref[...] = jnp.sum(e.reshape(tb // 8, 8, tc), axis=0)

    if nk == 1:
        # Single K step: no accumulator round-trip at all.
        finalize(prod)
    else:
        acc_ref = scratch[0]
        k = pl.program_id(2)

        @pl.when(k == 0)
        def _first():
            acc_ref[...] = prod

        @pl.when(k > 0)
        def _accum():
            acc_ref[...] += prod

        @pl.when(k == nk - 1)
        def _final():
            finalize(acc_ref[...])


def adacos_forward(x, W, label, *, s=None, training=True,
                   block_b=512, block_c=1024, block_k=512,
                   mxu_dtype=jnp.bfloat16):
    """AdaCos forward.

    x: (B, F) float, W: (C, F) float, label: (B,) int32.
    s: optional runtime scalar (previous AdaCos scale); defaults to the
       module's initial value sqrt(2)*log(C-1).  For a stateful training loop,
       pass the carried s here (it is a traced value, no recompile per step).
    """
    B, F_ = x.shape
    C = W.shape[0]
    s_init = math.sqrt(2.0) * math.log(C - 1)
    s_prev = jnp.float32(s_init) if s is None else jnp.asarray(s, jnp.float32)

    x = x.astype(jnp.float32)
    W = W.astype(jnp.float32)

    # --- per-row / per-class inverse norms: one cheap O(B*F + C*F) f32 pass ---
    eps = jnp.float32(1e-12)
    inv_x = jax.lax.rsqrt(jnp.maximum(jnp.sum(x * x, axis=1, keepdims=True),
                                      eps * eps))                  # (B, 1)
    inv_w = jax.lax.rsqrt(jnp.maximum(jnp.sum(W * W, axis=1),
                                      eps * eps))[None, :]          # (1, C)

    # --- tile sizes ------------------------------------------------------------
    # Defaults are 256-aligned (good for v6e/v7x 256-wide MXUs, fine for v5e's
    # 128-wide one); tiles only drop below that when the problem dims are small
    # (avoids extra pad traffic).  Working set with the defaults (bf16 inputs):
    #   2*(tb*tk + tk*tc)*2B + 2*tb*tc*4B + tb*tc*4B  ~= 11 MiB  < 16 MiB (v5e).
    tb = min(_round_up(block_b, 8), _round_up(B, 8))
    tc = min(_round_up(block_c, 128), _round_up(C, 128))
    tk = min(_round_up(block_k, 128), _round_up(F_, 128))
    B_pad, C_pad, F_pad = _round_up(B, tb), _round_up(C, tc), _round_up(F_, tk)
    nb, nc, nk = B_pad // tb, C_pad // tc, F_pad // tk

    # --- operand copies: cast (and pad only when strictly required) -----------
    xk = x.astype(mxu_dtype)
    if (B_pad, F_pad) != (B, F_):
        xk = jnp.pad(xk, ((0, B_pad - B), (0, F_pad - F_)))
    wtk = W.T.astype(mxu_dtype)                       # (F, C): RHS lane-dense in C
    if (F_pad, C_pad) != (F_, C):
        wtk = jnp.pad(wtk, ((0, F_pad - F_), (0, C_pad - C)))
    invx_p = inv_x if B_pad == B else jnp.pad(inv_x, ((0, B_pad - B), (0, 0)))
    invw_p = inv_w if C_pad == C else jnp.pad(inv_w, ((0, 0), (0, C_pad - C)))

    kernel = functools.partial(_adacos_kernel, nk=nk)
    scratch_shapes = [pltpu.VMEM((tb, tc), jnp.float32)] if nk > 1 else []

    logits_pad, bsum_part = pl.pallas_call(
        kernel,
        out_shape=(
            jax.ShapeDtypeStruct((B_pad, C_pad), jnp.float32),
            jax.ShapeDtypeStruct((nb * 8, C_pad), jnp.float32),
        ),
        grid=(nb, nc, nk),
        in_specs=[
            pl.BlockSpec(memory_space=pltpu.MemorySpace.SMEM),      # s (1,)
            pl.BlockSpec((tb, tk), lambda i, j, k: (i, k)),         # x tile
            pl.BlockSpec((tk, tc), lambda i, j, k: (k, j)),         # W^T tile
            pl.BlockSpec((tb, 1), lambda i, j, k: (i, 0)),          # inv ||x||
            pl.BlockSpec((1, tc), lambda i, j, k: (0, j)),          # inv ||w||
        ],
        out_specs=(
            pl.BlockSpec((tb, tc), lambda i, j, k: (i, j)),         # logits
            pl.BlockSpec((8, tc), lambda i, j, k: (i, j)),          # exp-sum partials
        ),
        scratch_shapes=scratch_shapes,
        compiler_params=pltpu.CompilerParams(
            dimension_semantics=("parallel", "parallel", "arbitrary")),
    )(jnp.reshape(s_prev, (1,)), xk, wtk, invx_p, invw_p)

    logits = logits_pad[:B, :C]

    if training:
        # O(B) glue (the torch.no_grad() block): theta at target positions only.
        logits_pos = logits[jnp.arange(B), label]                            # (B,)
        theta_pos = jnp.arccos(jnp.clip(logits_pos, -1.0 + 1e-7, 1.0 - 1e-7))
        # torch.median returns the LOWER of the two middle values for even counts.
        theta_med = jnp.sort(theta_pos)[(B - 1) // 2]
        # Padded x rows / W cols are zero => padded logits == 0 exactly, so each
        # padded cell contributed exp(s*0) == 1 to the in-kernel exp-sum.
        pad_cells = B_pad * C_pad - B * C
        bsum = (jnp.sum(bsum_part)
                - jnp.float32(pad_cells)
                - jnp.sum(jnp.exp(s_prev * logits_pos)))
        B_avg = bsum / jnp.float32(B)
        s_out = jnp.log(B_avg) / jnp.cos(
            jnp.minimum(jnp.float32(math.pi / 4.0), theta_med))
    else:
        s_out = s_prev

    # TODO(synk): the PyTorch module mutates self.s in place; a stateful caller
    # should carry s_out forward and pass it back via the `s=` argument.
    return s_out * logits


def _adacos_reference(x, W, label, *, s=None, training=True):
    """Pure-JAX f32 reference mirroring the PyTorch forward."""
    B, _ = x.shape
    C = W.shape[0]
    s0 = jnp.float32(math.sqrt(2.0) * math.log(C - 1)) if s is None else jnp.float32(s)
    eps = 1e-12
    xn = x / jnp.maximum(jnp.linalg.norm(x, axis=1, keepdims=True), eps)
    wn = W / jnp.maximum(jnp.linalg.norm(W, axis=1, keepdims=True), eps)
    logits = xn @ wn.T
    theta = jnp.arccos(jnp.clip(logits, -1.0 + 1e-7, 1.0 - 1e-7))
    if training:
        one_hot = jax.nn.one_hot(label, C, dtype=jnp.float32)
        B_avg = jnp.sum(jnp.where(one_hot < 1.0, jnp.exp(s0 * logits), 0.0)) / B
        theta_pos = theta[jnp.arange(B), label]
        theta_med = jnp.sort(theta_pos)[(B - 1) // 2]
        s_out = jnp.log(B_avg) / jnp.cos(
            jnp.minimum(jnp.float32(math.pi / 4.0), theta_med))
    else:
        s_out = s0
    return s_out * logits


if __name__ == "__main__":
    key = jax.random.PRNGKey(0)
    k1, k2, k3, k4, k5, k6 = jax.random.split(key, 6)

    # --- case 1: tiny single-tile (B=8, F=32, C=16), nk == 1 fast path --------
    B, NUM_FEATURES, NUM_CLASSES = 8, 32, 16
    x = jax.random.normal(k1, (B, NUM_FEATURES), dtype=jnp.float32)
    bound = math.sqrt(6.0 / (NUM_FEATURES + NUM_CLASSES))    # Xavier-uniform
    W = jax.random.uniform(k2, (NUM_CLASSES, NUM_FEATURES), jnp.float32,
                           -bound, bound)
    label = jax.random.randint(k3, (B,), 0, NUM_CLASSES, dtype=jnp.int32)

    ref = _adacos_reference(x, W, label, training=True)

    # Exactness: f32-MXU path must match the f32 reference tightly.
    out_f32 = jax.block_until_ready(
        adacos_forward(x, W, label, training=True, mxu_dtype=jnp.float32))
    assert out_f32.shape == (B, NUM_CLASSES)
    assert jnp.allclose(out_f32, ref, atol=1e-4, rtol=1e-4), "f32 train mismatch"

    # Default bf16-MXU path (f32 accumulation): operand rounding dominates,
    # so compare with a correspondingly relaxed tolerance.
    out_bf16 = jax.block_until_ready(adacos_forward(x, W, label, training=True))
    assert jnp.allclose(out_bf16, ref, atol=5e-2, rtol=5e-2), "bf16 train mismatch"

    out_eval = jax.block_until_ready(
        adacos_forward(x, W, label, training=False, mxu_dtype=jnp.float32))
    ref_eval = _adacos_reference(x, W, label, training=False)
    assert jnp.allclose(out_eval, ref_eval, atol=1e-4, rtol=1e-4), "eval mismatch"

    # Runtime (stateful) s: jit once, feed s as a traced scalar.
    f = jax.jit(lambda xx, ww, ll, ss: adacos_forward(
        xx, ww, ll, s=ss, training=True, mxu_dtype=jnp.float32))
    out_s = jax.block_until_ready(f(x, W, label, jnp.float32(5.0)))
    ref_s = _adacos_reference(x, W, label, s=5.0, training=True)
    assert jnp.allclose(out_s, ref_s, atol=1e-4, rtol=1e-4), "runtime-s mismatch"

    # --- case 2: multi-tile 3x3x3 grid with B/C padding (nk > 1 path) ---------
    B2, F2, C2 = 44, 384, 300
    x2 = jax.random.normal(k4, (B2, F2), dtype=jnp.float32)
    bound2 = math.sqrt(6.0 / (F2 + C2))
    W2 = jax.random.uniform(k5, (C2, F2), jnp.float32, -bound2, bound2)
    label2 = jax.random.randint(k6, (B2,), 0, C2, dtype=jnp.int32)

    ref2 = _adacos_reference(x2, W2, label2, training=True)
    out2_f32 = jax.block_until_ready(
        adacos_forward(x2, W2, label2, training=True,
                       block_b=16, block_c=128, block_k=128,
                       mxu_dtype=jnp.float32))
    assert out2_f32.shape == (B2, C2)
    assert jnp.allclose(out2_f32, ref2, atol=1e-4, rtol=1e-4), "tiled f32 mismatch"

    out2_bf16 = jax.block_until_ready(
        adacos_forward(x2, W2, label2, training=True,
                       block_b=16, block_c=128, block_k=128))
    assert jnp.allclose(out2_bf16, ref2, atol=5e-2, rtol=5e-2), "tiled bf16 mismatch"

    print("KERNEL_OK")
</pallas_src>

<mosaic_0001>
module attributes {stable_mosaic.version = 11 : i64} {
  func.func @_adacos_kernel(%arg0: i32, %arg1: i32, %arg2: i32, %arg3: memref<1xf32, #tpu.memory_space<smem>>, %arg4: memref<8x128xf32, #tpu.memory_space<vmem>>, %arg5: memref<128x128xf32, #tpu.memory_space<vmem>>, %arg6: memref<8x1xf32, #tpu.memory_space<vmem>>, %arg7: memref<1x128xf32, #tpu.memory_space<vmem>>, %arg8: memref<8x128xf32, #tpu.memory_space<vmem>>, %arg9: memref<8x128xf32, #tpu.memory_space<vmem>>) attributes {dimension_semantics = [#tpu.dimension_semantics<parallel>, #tpu.dimension_semantics<parallel>, #tpu.dimension_semantics<arbitrary>], iteration_bounds = array<i64: 1, 1, 1>, scalar_prefetch = 0 : i64, scratch_operands = 0 : i64, tpu.core_type = #tpu.core_type<tc>, window_params = [{transform_indices = @transform_0, window_bounds = array<i64: 1>}, {transform_indices = @transform_1, window_bounds = array<i64: 8, 128>}, {transform_indices = @transform_2, window_bounds = array<i64: 128, 128>}, {transform_indices = @transform_3, window_bounds = array<i64: 8, 1>}, {transform_indices = @transform_4, window_bounds = array<i64: 1, 128>}, {transform_indices = @transform_5, window_bounds = array<i64: 8, 128>}, {transform_indices = @transform_6, window_bounds = array<i64: 8, 128>}]} {
    %c0 = arith.constant 0 : index
    %0 = memref.load %arg3[%c0] : memref<1xf32, #tpu.memory_space<smem>>
    %c0_0 = arith.constant 0 : index
    %c0_1 = arith.constant 0 : index
    %1 = vector.load %arg4[%c0_0, %c0_1] : memref<8x128xf32, #tpu.memory_space<vmem>>, vector<8x128xf32>
    %c0_2 = arith.constant 0 : index
    %c0_3 = arith.constant 0 : index
    %2 = vector.load %arg5[%c0_2, %c0_3] : memref<128x128xf32, #tpu.memory_space<vmem>>, vector<128x128xf32>
    %cst = arith.constant dense<0.000000e+00> : vector<8x128xf32>
    %3 = tpu.matmul %1, %2, %cst {dimension_numbers = #tpu.dot_dimension_numbers<[1], [0], [0], [1], [0, 0, 1, 1], [], []>} : vector<8x128xf32>, vector<128x128xf32>, vector<8x128xf32> -> vector<8x128xf32>
    %c0_4 = arith.constant 0 : index
    %c0_5 = arith.constant 0 : index
    %4 = vector.load %arg6[%c0_4, %c0_5] : memref<8x1xf32, #tpu.memory_space<vmem>>, vector<8x1xf32>
    %5 = vector.broadcast %4 : vector<8x1xf32> to vector<8x128xf32>
    %6 = arith.mulf %3, %5 : vector<8x128xf32>
    %c0_6 = arith.constant 0 : index
    %c0_7 = arith.constant 0 : index
    %7 = vector.load %arg7[%c0_6, %c0_7] : memref<1x128xf32, #tpu.memory_space<vmem>>, vector<1x128xf32>
    %8 = vector.broadcast %7 : vector<1x128xf32> to vector<8x128xf32>
    %9 = arith.mulf %6, %8 : vector<8x128xf32>
    %c0_8 = arith.constant 0 : index
    %c0_9 = arith.constant 0 : index
    %10 = vector.load %arg8[%c0_8, %c0_9] : memref<8x128xf32, #tpu.memory_space<vmem>>, vector<8x128xf32>
    tpu.vector_store %arg8[%c0_8, %c0_9], %9 {strides = array<i32>} : memref<8x128xf32, #tpu.memory_space<vmem>>, vector<8x128xf32>,
    %11 = vector.broadcast %0 : f32 to vector<8x128xf32>
    %12 = arith.mulf %11, %9 : vector<8x128xf32>
    %13 = math.exp %12 : vector<8x128xf32>
    %14 = vector.shape_cast %13 : vector<8x128xf32> to vector<1x8x128xf32>
    %cst_10 = arith.constant dense<0.000000e+00> : vector<8x128xf32>
    %15 = vector.multi_reduction <add>, %14, %cst_10 [0] : vector<1x8x128xf32> to vector<8x128xf32>
    %c0_11 = arith.constant 0 : index
    %c0_12 = arith.constant 0 : index
    %16 = vector.load %arg9[%c0_11, %c0_12] : memref<8x128xf32, #tpu.memory_space<vmem>>, vector<8x128xf32>
    tpu.vector_store %arg9[%c0_11, %c0_12], %15 {strides = array<i32>} : memref<8x128xf32, #tpu.memory_space<vmem>>, vector<8x128xf32>,
    return
  }
  func.func @transform_0(%arg0: i32, %arg1: i32, %arg2: i32) -> i32 {
    %c0_i32 = arith.constant 0 : i32
    %c0_i32_0 = arith.constant 0 : i32
    return %c0_i32 : i32
  }
  func.func @transform_1(%arg0: i32, %arg1: i32, %arg2: i32) -> (i32, i32) {
    %c0_i32 = arith.constant 0 : i32
    return %arg0, %arg2 : i32, i32
  }
  func.func @transform_2(%arg0: i32, %arg1: i32, %arg2: i32) -> (i32, i32) {
    %c0_i32 = arith.constant 0 : i32
    return %arg2, %arg1 : i32, i32
  }
  func.func @transform_3(%arg0: i32, %arg1: i32, %arg2: i32) -> (i32, i32) {
    %c0_i32 = arith.constant 0 : i32
    %c0_i32_0 = arith.constant 0 : i32
    return %arg0, %c0_i32 : i32, i32
  }
  func.func @transform_4(%arg0: i32, %arg1: i32, %arg2: i32) -> (i32, i32) {
    %c0_i32 = arith.constant 0 : i32
    %c0_i32_0 = arith.constant 0 : i32
    return %c0_i32, %arg1 : i32, i32
  }
  func.func @transform_5(%arg0: i32, %arg1: i32, %arg2: i32) -> (i32, i32) {
    %c0_i32 = arith.constant 0 : i32
    return %arg0, %arg1 : i32, i32
  }
  func.func @transform_6(%arg0: i32, %arg1: i32, %arg2: i32) -> (i32, i32) {
    %c0_i32 = arith.constant 0 : i32
    return %arg0, %arg1 : i32, i32
  }
}

</mosaic_0001>

<bundles_post_ra>
// kernel: tpu_custom_call.1
= control target key start
LH: loop header
LB: loop body
LE: loop exit
PB: predicated region body
PF: predicated region fallthrough
CT: control target
= control target key end

     0   :  { %13 = vsyncpa [#allocation4], 0  ;;  %s281_s0 = inlined_call_operand.<no memory space> [shape: f32[1], index: 0, kind: input, shape index: {}]   ;;  %s282_s1 = inlined_call_operand.vmem [shape: f32[8,128], index: 1, kind: input, shape index: {}]   ;;  %s283_s2 = inlined_call_operand.hbm [shape: f32[128,128], index: 2, kind: input, shape index: {}]   ;;  %s284_s3 = inlined_call_operand.vmem [shape: f32[8,1], index: 3, kind: input, shape index: {}]   ;;  %s285_s4 = inlined_call_operand.vmem [shape: f32[1,128], index: 4, kind: input, shape index: {}]   ;;  %s286_s5 = inlined_call_operand.hbm [shape: f32[8,128], index: 5, kind: output, shape index: {0}]   ;;  %s287_s6 = inlined_call_operand.hbm [shape: f32[8,128], index: 6, kind: output, shape index: {1}]  }
   0x1   :  { %14 = vsyncpa [#allocation5], 0 }
   0x2   :  { %15 = vsyncpa [#allocation8], 0  ;;  %s24_s23 = sshll.u32 %s283_s2, 4  ;;  %s219_s24 = smov [#allocation3]   ;;  %s25_s23 = int_to_ptr.hbm [resolvable:$true] %s24_s23 }
   0x3   :  { %s26_s25 = sshll.u32 %s219_s24, 4  ;;  %s220_s26 = smov 128   ;;  %s27_s25 = int_to_ptr.vmem [resolvable:$true] %s26_s25 }
   0x4   :  { %s221_s27 = smov 8  }
   0x5   :  { %32 = dma.hbm_to_vmem [thread:$0]  %s25_s23, 2048, %s27_s25, [#allocation4], %s220_s26, %s220_s26, %s221_s27  }
   0x6   :  { %213 = dma.done.wait [#allocation4], 2048  }
   0x7   :  { %214 = vsyncadd [#allocation4], 4294965248  ;;  %v58_v0 = vld [vmem:[#allocation3 + $0x78] sm:$0xff]  ;;  %v57_v1 = vld [vmem:[#allocation3 + $0x70] sm:$0xff]  ;;  %v222_v2 = vmov 0   ;;  %s223_s8 = smov [#allocation6]   ;;  %v92_v23 = vstv %s281_s0 }
   0x8   :  { %59 = vmatpush.msra.mxu0 %v58_v0  ;;  %137 = vset.pattern.permute.xlu0 %v222_v2  ;;  %v56_v3 = vld [vmem:[#allocation3 + $0x68] sm:$0xff]  ;;  %v55_v4 = vld [vmem:[#allocation3 + $0x60] sm:$0xff]  ;;  %v54_v6 = vld [vmem:[#allocation3 + $0x58] sm:$0xff]  ;;  %s103_s9 = sshll.u32 %s223_s8, 4  ;;  %s105_s12 = sshll.u32 %s286_s5, 4  ;;  %s104_s9 = int_to_ptr.vmem [resolvable:$true] %s103_s9  ;;  %s106_s12 = int_to_ptr.hbm [resolvable:$true] %s105_s12 }
   0x9   :  { %v79_v5 = vld [vmem:[%s284_s3] sm:$0xff]  ;;  %v53_v7 = vld [vmem:[#allocation3 + $0x50] sm:$0xff]  ;;  %v52_v8 = vld [vmem:[#allocation3 + $0x48] sm:$0xff]  ;;  %s116_s17 = sshll.u32 %s287_s6, 4  ;;  %s117_s17 = int_to_ptr.hbm [resolvable:$true] %s116_s17 }
   0xa   :  { %60 = vmatpush.msra.mxu0 %v57_v1  ;;  %82 = vperm.xlu0 %137, %v79_v5   ;;  %v51_v9 = vld [vmem:[#allocation3 + $0x40] sm:$0xff]  ;;  %v50_v10 = vld [vmem:[#allocation3 + $0x38] sm:$0xff]  ;;  %v49_v11 = vld [vmem:[#allocation3 + $0x30] sm:$0xff] }
   0xb   :  { %v48_v12 = vld [vmem:[#allocation3 + $0x28] sm:$0xff]  ;;  %v47_v13 = vld [vmem:[#allocation3 + $0x20] sm:$0xff]  ;;  %v46_v14 = vld [vmem:[#allocation3 + $0x18] sm:$0xff] }
   0xc   :  { %61 = vmatpush.msra.mxu0 %v56_v3  ;;  %v45_v15 = vld [vmem:[#allocation3 + $0x10] sm:$0xff]  ;;  %v44_v16 = vld [vmem:[#allocation3 + $0x8] sm:$0xff]  ;;  %v43_v17 = vld [vmem:[#allocation3] sm:$0xff] }
   0xd   :  { %v42_v18 = vld [vmem:[%s282_s1] sm:$0xff]  ;;  %s224_s1 = smov [#allocation7]  }
   0xe   :  { %62 = vmatpush.msra.mxu0 %v55_v4  ;;  %v138_v20 = vld [vmem:[%s285_s4] ss:$0 sm:$0xff]  ;;  %s114_s4 = sshll.u32 %s224_s1, 4  ;;  %s115_s4 = int_to_ptr.vmem [resolvable:$true] %s114_s4 }
  0x10   :  { %63 = vmatpush.msra.mxu0 %v54_v6 }
  0x12   :  { %64 = vmatpush.msra.mxu0 %v53_v7 }
  0x14   :  { %65 = vmatpush.msra.mxu0 %v52_v8 }
  0x16   :  { %66 = vmatpush.msra.mxu0 %v51_v9 }
  0x18   :  { %67 = vmatpush.msra.mxu0 %v50_v10 }
  0x1a   :  { %68 = vmatpush.msra.mxu0 %v49_v11 }
  0x1c   :  { %69 = vmatpush.msra.mxu0 %v48_v12 }
  0x1e   :  { %70 = vmatpush.msra.mxu0 %v47_v13 }
  0x20   :  { %71 = vmatpush.msra.mxu0 %v46_v14 }
  0x22   :  { %72 = vmatpush.msra.mxu0 %v45_v15 }
  0x24   :  { %73 = vmatpush.msra.mxu0 %v44_v16 }
  0x26   :  { %74 = vmatpush.msra.mxu0 %v43_v17 }
  0x27   :  { %75 = vmatmul.f32.vlgmr.msra.gmra.mxu0 %v42_v18 }
  0x7c   :  { %v83_v19 = vpop.permute.xlu0 %82 }
  0xa4   :  { %v76_v21 = vpop.f32.mrf.mxu0 }
  0xa5   :  { %v85_v22 = vmul.f32 %v83_v19, %v76_v21 }
  0xa7   :  { %v90_v24 = vmul.f32 %v138_v20, %v85_v22 }
  0xa9   :  { %v93_v25 = vmul.f32 %v92_v23, %v90_v24  ;;  %91 = vst [vmem:[#allocation6] sm:$0xff] %v90_v24 }
  0xaa   :  { %108 = dma.vmem_to_hbm [thread:$0]  %s104_s9, 128, %s106_s12, [#allocation5]  }
  0xab   :  { %v94_v26 = vmul.f32 1.442695, %v93_v25 }
  0xad   :  { %139 = vpow2.f32 %v94_v26 }
  0xb3   :  { %v140_v27 = vpop.eup %139 }
  0xb4   :  { %97 = vst [vmem:[#allocation7] sm:$0xff] %v140_v27 }
  0xb5   :  { %119 = dma.vmem_to_hbm [thread:$0]  %s115_s4, 128, %s117_s17, [#allocation8]  }
  0xb6   :  { %215 = dma.done.wait [#allocation5], 128  }
  0xb7   :  { %216 = vsyncadd [#allocation5], 4294967168 }
  0xb8   :  { %217 = dma.done.wait [#allocation8], 128  }
  0xb9   :  { %218 = vsyncadd [#allocation8], 4294967168 }
  0xba   :  { %128 = vsyncpa [#allocation4], 1 }
  0xbb   :  { %129 = vsyncpa [#allocation5], 1 }
  0xbc   :  { %130 = vsyncpa [#allocation8], 1 }

</bundles_post_ra>
